<compile_context>
chip_gen: v5e
topology: v5e:2x2
jax: 0.10.0
libtpu: 0.0.40
codegen_flags: <defaults>
</compile_context>

<pallas_src>
import jax
import jax.numpy as jnp
from jax import lax
from jax.experimental import pallas as pl
from jax.experimental.pallas import tpu as pltpu

KERNEL_SIZE = 7
PAD = (KERNEL_SIZE - 1) // 2


def _round_up(a, b):
    return ((a + b - 1) // b) * b


# --------------------------------------------------------------------------
# Kernel helpers
# --------------------------------------------------------------------------
def _feats(x_native):
    """Channel-sum (f32 accumulation) and channel-max of a (TB, C, W) tile."""
    s = jnp.sum(x_native, axis=1, dtype=jnp.float32)          # (TB, W)
    m = jnp.max(x_native, axis=1).astype(jnp.float32)         # (TB, W)
    return s, m


def _gate_from_feats(s, m, p_ref):
    """Conv1d(2->1, K=7, pad=3) + ReLU + folded BN + sigmoid on per-lane feats.

    s, m: (TB, W) f32.  Caller guarantees that any lane a conv tap may read
    outside the valid range is either a zero lane or only feeds an output lane
    that is sliced off, so no edge masks are needed.
    p_ref (SMEM): [w_avg*K (1/C folded), w_max*K, conv_bias, bn_scale, bn_shift]
    """
    tb, w = s.shape
    acc = jnp.full((tb, w), p_ref[2 * KERNEL_SIZE], dtype=jnp.float32)  # bias
    for k in range(KERNEL_SIZE):
        d = k - PAD
        if d == 0:
            ss, mm = s, m
        else:
            sh = (-d) % w
            ss = pltpu.roll(s, sh, 1)
            mm = pltpu.roll(m, sh, 1)
        acc = acc + p_ref[k] * ss + p_ref[KERNEL_SIZE + k] * mm
    r = jnp.maximum(acc, 0.0)
    return jax.nn.sigmoid(r * p_ref[2 * KERNEL_SIZE + 1]
                          + p_ref[2 * KERNEL_SIZE + 2])


# --------------------------------------------------------------------------
# Kernels
# --------------------------------------------------------------------------
def spatial_gate_kernel(x_ref, p_ref, o_ref):
    """Fused path: one grid step sees the full (padded) L of TB samples."""
    s, m = _feats(x_ref[...])
    y = _gate_from_feats(s, m, p_ref)                          # (TB, Lp) f32
    # Gate multiply in the native dtype; only the (TB, Lp) gate is cast.
    o_ref[...] = x_ref[...] * y.astype(o_ref.dtype)[:, None, :]


def spatial_gate_split_kernel(x_ref, xl_ref, xr_ref, p_ref, o_ref):
    """L-slab path: slab tile + 128-lane left/right halo chunks of x."""
    l = pl.program_id(1)
    n_l = pl.num_programs(1)
    tl = x_ref.shape[-1]

    s_c, m_c = _feats(x_ref[...])                              # (TB, TL)
    s_l, m_l = _feats(xl_ref[...])                             # (TB, 128)
    s_r, m_r = _feats(xr_ref[...])                             # (TB, 128)

    # Halo block indices are clamped at the global edges; zero the features
    # there so they act as the conv's zero padding.
    s_l = jnp.where(l > 0, s_l, 0.0)
    m_l = jnp.where(l > 0, m_l, 0.0)
    s_r = jnp.where(l < n_l - 1, s_r, 0.0)
    m_r = jnp.where(l < n_l - 1, m_r, 0.0)

    s = jnp.concatenate([s_l, s_c, s_r], axis=-1)              # (TB, TL + 256)
    m = jnp.concatenate([m_l, m_c, m_r], axis=-1)

    y = _gate_from_feats(s, m, p_ref)[:, 128:128 + tl]         # (TB, TL)
    o_ref[...] = x_ref[...] * y.astype(o_ref.dtype)[:, None, :]


# --------------------------------------------------------------------------
# Wrapper
# --------------------------------------------------------------------------
def _device_profile():
    try:
        kind = jax.devices()[0].device_kind.lower()
    except Exception:
        kind = ""
    is_v7 = "7" in kind
    big_vmem = (not is_v7) and any(t in kind for t in ("v4", "v5", "v6"))
    if big_vmem:
        # 128 MiB VMEM class (v5e/v6e/...): large tiles amortize per-step cost.
        tile_target, vmem_limit = 16 << 20, 96 << 20
    else:
        # v7x (64 MiB VMEM) or unknown: conservative.
        tile_target, vmem_limit = 4 << 20, 48 << 20
    return is_v7, tile_target, vmem_limit


def _choose_tiling(B, C, L, itemsize, force_lane_tile=None):
    is_v7, tile_target, vmem_limit = _device_profile()

    sublane = max(8, 32 // itemsize)            # f32 -> 8, bf16 -> 16, i8 -> 32
    c_pad = _round_up(C, sublane)               # real VMEM footprint of C
    chunk_bytes = c_pad * 128 * itemsize        # one sample, one 128-lane chunk

    # >= PAD trailing zero lanes so the conv needs no edge masks.
    l_min = _round_up(L + PAD, 128)
    chunks = l_min // 128

    if force_lane_tile is not None:
        tl_chunks = max(1, int(force_lane_tile) // 128)
        n_l = -(-chunks // tl_chunks)
    else:
        if chunks * chunk_bytes > tile_target:
            # A full-L slab busts the tile budget: split L.
            tl_chunks = max(1, tile_target // chunk_bytes)
        else:
            tl_chunks = chunks
        n_l = -(-chunks // tl_chunks)
        tl_chunks = -(-chunks // n_l)           # rebalance -> fewer pad lanes

    slab_bytes = max(1, tl_chunks * chunk_bytes)
    tb = max(1, min(B, tile_target // slab_bytes))
    grid_b = -(-B // tb)

    if is_v7 and force_lane_tile is None:
        # >= 2 pipelined steps per TensorCore from the batch when B permits.
        want_b = min(B, 4)
        if grid_b < want_b:
            tb = -(-B // want_b)
            grid_b = -(-B // tb)
        # B == 1 style workloads: split L so both TensorCores get work.
        if grid_b * n_l < 2 and chunks >= 2:
            tl_chunks = -(-chunks // 2)
            n_l = -(-chunks // tl_chunks)

    tl = tl_chunks * 128
    l_pad = tl * n_l
    b_pad = grid_b * tb
    return tb, grid_b, b_pad, tl, n_l, l_pad, vmem_limit


def spatial_gate_1d(x, conv_w, conv_b, bn_gamma, bn_beta, bn_mean, bn_var,
                    bn_eps=1e-5, *, _force_lane_tile=None):
    """x: (B, C, L); conv_w: (1, 2, K).  Returns (B, C, L)."""
    B, C, L = x.shape
    itemsize = jnp.dtype(x.dtype).itemsize

    tb, grid_b, b_pad, tl, n_l, l_pad, vmem_limit = _choose_tiling(
        B, C, L, itemsize, force_lane_tile=_force_lane_tile)

    xp = x
    if b_pad != B or l_pad != L:
        xp = jnp.pad(x, ((0, b_pad - B), (0, 0), (0, l_pad - L)))

    # Fold eval-mode BN into (scale, shift) and 1/C into the avg-channel taps
    # (the kernel reduces with a channel *sum*); pack everything into SMEM.
    w2d = jnp.asarray(conv_w, jnp.float32).reshape(2, KERNEL_SIZE)
    scale = (jnp.asarray(bn_gamma, jnp.float32)
             * lax.rsqrt(jnp.asarray(bn_var, jnp.float32) + jnp.float32(bn_eps)))
    shift = (jnp.asarray(bn_beta, jnp.float32)
             - jnp.asarray(bn_mean, jnp.float32) * scale)
    params = jnp.concatenate([
        w2d[0] * (1.0 / C),                                     # avg taps / C
        w2d[1],                                                 # max taps
        jnp.stack([jnp.asarray(conv_b, jnp.float32).reshape(()), scale, shift]),
    ])                                                          # (2K + 3,)

    flops = int(b_pad) * int(l_pad) * (3 * C + 8 * KERNEL_SIZE + 8)
    bytes_accessed = 2 * int(b_pad) * C * int(l_pad) * itemsize

    if n_l == 1:
        grid = (grid_b,)
        in_specs = [
            pl.BlockSpec((tb, C, l_pad), lambda b: (b, 0, 0)),
            pl.BlockSpec(memory_space=pltpu.SMEM),
        ]
        out_specs = pl.BlockSpec((tb, C, l_pad), lambda b: (b, 0, 0))
        kernel = spatial_gate_kernel
        operands = (xp, params)
        dims = ("parallel",)
    else:
        tlc = tl // 128
        n_chunks = l_pad // 128
        grid = (grid_b, n_l)
        in_specs = [
            pl.BlockSpec((tb, C, tl), lambda b, l: (b, 0, l)),
            pl.BlockSpec((tb, C, 128),
                         lambda b, l: (b, 0, jnp.maximum(l * tlc - 1, 0))),
            pl.BlockSpec((tb, C, 128),
                         lambda b, l: (b, 0, jnp.minimum((l + 1) * tlc,
                                                         n_chunks - 1))),
            pl.BlockSpec(memory_space=pltpu.SMEM),
        ]
        out_specs = pl.BlockSpec((tb, C, tl), lambda b, l: (b, 0, l))
        kernel = spatial_gate_split_kernel
        operands = (xp, xp, xp, params)
        dims = ("parallel", "parallel")
        bytes_accessed += 2 * int(b_pad) * n_l * C * 128 * itemsize

    out = pl.pallas_call(
        kernel,
        out_shape=jax.ShapeDtypeStruct((b_pad, C, l_pad), x.dtype),
        grid_spec=pltpu.PrefetchScalarGridSpec(
            num_scalar_prefetch=0,
            grid=grid,
            in_specs=in_specs,
            out_specs=out_specs,
        ),
        compiler_params=pltpu.CompilerParams(
            dimension_semantics=dims,
            vmem_limit_bytes=vmem_limit),
        cost_estimate=pl.CostEstimate(
            flops=flops,
            transcendentals=int(b_pad) * int(l_pad),
            bytes_accessed=bytes_accessed),
    )(*operands)

    if b_pad != B or l_pad != L:
        out = out[:B, :, :L]
    return out


# --------------------------------------------------------------------------
# Pure-JAX reference (eval-mode BN) for correctness checking
# --------------------------------------------------------------------------
def spatial_gate_1d_ref(x, conv_w, conv_b, bn_gamma, bn_beta, bn_mean, bn_var,
                        bn_eps=1e-5):
    avg = jnp.mean(x, axis=1, keepdims=True)           # (B, 1, L)
    mx = jnp.max(x, axis=1, keepdims=True)             # (B, 1, L)
    feat = jnp.concatenate([avg, mx], axis=1)          # (B, 2, L)
    conv = lax.conv_general_dilated(
        feat, conv_w, window_strides=(1,), padding=[(PAD, PAD)],
        dimension_numbers=("NCH", "OIH", "NCH")) + conv_b.reshape(1, 1, 1)
    r = jnp.maximum(conv, 0.0)
    yb = bn_gamma * (r - bn_mean) / jnp.sqrt(bn_var + bn_eps) + bn_beta
    y = jax.nn.sigmoid(yb)                             # (B, 1, L)
    return x * y


if __name__ == "__main__":
    key = jax.random.PRNGKey(0)
    kx, kw, kb, kx2 = jax.random.split(key, 4)

    # Small shapes consistent with the module: batch=2, channels=4, length=16.
    B, C, L = 2, 4, 16
    x = jax.random.normal(kx, (B, C, L), dtype=jnp.float32)

    # Synthetic parameters (shapes from nn.Conv1d(2, 1, 7) and nn.BatchNorm1d(1)).
    conv_w = 0.1 * jax.random.normal(kw, (1, 2, KERNEL_SIZE), dtype=jnp.float32)
    conv_b = 0.05 * jax.random.normal(kb, (1,), dtype=jnp.float32)
    bn_gamma = jnp.float32(1.2)
    bn_beta = jnp.float32(0.1)
    bn_mean = jnp.float32(0.05)
    bn_var = jnp.float32(0.9)

    out = spatial_gate_1d(x, conv_w, conv_b, bn_gamma, bn_beta, bn_mean, bn_var)
    out = jax.block_until_ready(out)
    ref = spatial_gate_1d_ref(x, conv_w, conv_b, bn_gamma, bn_beta, bn_mean,
                              bn_var)
    assert out.shape == (B, C, L)
    assert jnp.allclose(out, ref, atol=1e-5, rtol=1e-5), "mismatch (fused path)"

    # Also exercise the L-slab (halo) path with a forced 128-lane tile.
    B2, C2, L2 = 1, 3, 300
    x2 = jax.random.normal(kx2, (B2, C2, L2), dtype=jnp.float32)
    out2 = spatial_gate_1d(x2, conv_w, conv_b, bn_gamma, bn_beta, bn_mean,
                           bn_var, _force_lane_tile=128)
    out2 = jax.block_until_ready(out2)
    ref2 = spatial_gate_1d_ref(x2, conv_w, conv_b, bn_gamma, bn_beta, bn_mean,
                               bn_var)
    assert out2.shape == (B2, C2, L2)
    assert jnp.allclose(out2, ref2, atol=1e-5, rtol=1e-5), "mismatch (split path)"

    print("KERNEL_OK")
</pallas_src>

<mosaic_0001>
module attributes {stable_mosaic.version = 11 : i64} {
  func.func @spatial_gate_kernel(%arg0: i32, %arg1: memref<2x4x128xf32, #tpu.memory_space<vmem>>, %arg2: memref<17xf32, #tpu.memory_space<smem>>, %arg3: memref<2x4x128xf32, #tpu.memory_space<vmem>>) attributes {dimension_semantics = [#tpu.dimension_semantics<parallel>], iteration_bounds = array<i64: 1>, scalar_prefetch = 0 : i64, scratch_operands = 0 : i64, tpu.core_type = #tpu.core_type<tc>, window_params = [{transform_indices = @transform_0, window_bounds = array<i64: 2, 4, 128>}, {transform_indices = @transform_1, window_bounds = array<i64: 17>}, {transform_indices = @transform_2, window_bounds = array<i64: 2, 4, 128>}]} {
    %c0 = arith.constant 0 : index
    %c0_0 = arith.constant 0 : index
    %c0_1 = arith.constant 0 : index
    %0 = vector.load %arg1[%c0, %c0_0, %c0_1] : memref<2x4x128xf32, #tpu.memory_space<vmem>>, vector<2x4x128xf32>
    %cst = arith.constant dense<0.000000e+00> : vector<2x128xf32>
    %1 = vector.multi_reduction <add>, %0, %cst [1] : vector<2x4x128xf32> to vector<2x128xf32>
    %cst_2 = arith.constant dense<0xFF800000> : vector<2x128xf32>
    %2 = vector.multi_reduction <maximumf>, %0, %cst_2 [1] : vector<2x4x128xf32> to vector<2x128xf32>
    %c14 = arith.constant 14 : index
    %3 = memref.load %arg2[%c14] : memref<17xf32, #tpu.memory_space<smem>>
    %4 = vector.broadcast %3 : f32 to vector<2x128xf32>
    %c3_i32 = arith.constant 3 : i32
    %5 = tpu.dynamic_rotate %1 by %c3_i32 dim 1 : vector<2x128xf32>, i32 -> vector<2x128xf32>
    %c3_i32_3 = arith.constant 3 : i32
    %6 = tpu.dynamic_rotate %2 by %c3_i32_3 dim 1 : vector<2x128xf32>, i32 -> vector<2x128xf32>
    %c0_4 = arith.constant 0 : index
    %7 = memref.load %arg2[%c0_4] : memref<17xf32, #tpu.memory_space<smem>>
    %8 = vector.broadcast %7 : f32 to vector<2x128xf32>
    %9 = arith.mulf %8, %5 : vector<2x128xf32>
    %10 = arith.addf %4, %9 : vector<2x128xf32>
    %c7 = arith.constant 7 : index
    %11 = memref.load %arg2[%c7] : memref<17xf32, #tpu.memory_space<smem>>
    %12 = vector.broadcast %11 : f32 to vector<2x128xf32>
    %13 = arith.mulf %12, %6 : vector<2x128xf32>
    %14 = arith.addf %10, %13 : vector<2x128xf32>
    %c2_i32 = arith.constant 2 : i32
    %15 = tpu.dynamic_rotate %1 by %c2_i32 dim 1 : vector<2x128xf32>, i32 -> vector<2x128xf32>
    %c2_i32_5 = arith.constant 2 : i32
    %16 = tpu.dynamic_rotate %2 by %c2_i32_5 dim 1 : vector<2x128xf32>, i32 -> vector<2x128xf32>
    %c1 = arith.constant 1 : index
    %17 = memref.load %arg2[%c1] : memref<17xf32, #tpu.memory_space<smem>>
    %18 = vector.broadcast %17 : f32 to vector<2x128xf32>
    %19 = arith.mulf %18, %15 : vector<2x128xf32>
    %20 = arith.addf %14, %19 : vector<2x128xf32>
    %c8 = arith.constant 8 : index
    %21 = memref.load %arg2[%c8] : memref<17xf32, #tpu.memory_space<smem>>
    %22 = vector.broadcast %21 : f32 to vector<2x128xf32>
    %23 = arith.mulf %22, %16 : vector<2x128xf32>
    %24 = arith.addf %20, %23 : vector<2x128xf32>
    %c1_i32 = arith.constant 1 : i32
    %25 = tpu.dynamic_rotate %1 by %c1_i32 dim 1 : vector<2x128xf32>, i32 -> vector<2x128xf32>
    %c1_i32_6 = arith.constant 1 : i32
    %26 = tpu.dynamic_rotate %2 by %c1_i32_6 dim 1 : vector<2x128xf32>, i32 -> vector<2x128xf32>
    %c2 = arith.constant 2 : index
    %27 = memref.load %arg2[%c2] : memref<17xf32, #tpu.memory_space<smem>>
    %28 = vector.broadcast %27 : f32 to vector<2x128xf32>
    %29 = arith.mulf %28, %25 : vector<2x128xf32>
    %30 = arith.addf %24, %29 : vector<2x128xf32>
    %c9 = arith.constant 9 : index
    %31 = memref.load %arg2[%c9] : memref<17xf32, #tpu.memory_space<smem>>
    %32 = vector.broadcast %31 : f32 to vector<2x128xf32>
    %33 = arith.mulf %32, %26 : vector<2x128xf32>
    %34 = arith.addf %30, %33 : vector<2x128xf32>
    %c3 = arith.constant 3 : index
    %35 = memref.load %arg2[%c3] : memref<17xf32, #tpu.memory_space<smem>>
    %36 = vector.broadcast %35 : f32 to vector<2x128xf32>
    %37 = arith.mulf %36, %1 : vector<2x128xf32>
    %38 = arith.addf %34, %37 : vector<2x128xf32>
    %c10 = arith.constant 10 : index
    %39 = memref.load %arg2[%c10] : memref<17xf32, #tpu.memory_space<smem>>
    %40 = vector.broadcast %39 : f32 to vector<2x128xf32>
    %41 = arith.mulf %40, %2 : vector<2x128xf32>
    %42 = arith.addf %38, %41 : vector<2x128xf32>
    %c127_i32 = arith.constant 127 : i32
    %43 = tpu.dynamic_rotate %1 by %c127_i32 dim 1 : vector<2x128xf32>, i32 -> vector<2x128xf32>
    %c127_i32_7 = arith.constant 127 : i32
    %44 = tpu.dynamic_rotate %2 by %c127_i32_7 dim 1 : vector<2x128xf32>, i32 -> vector<2x128xf32>
    %c4 = arith.constant 4 : index
    %45 = memref.load %arg2[%c4] : memref<17xf32, #tpu.memory_space<smem>>
    %46 = vector.broadcast %45 : f32 to vector<2x128xf32>
    %47 = arith.mulf %46, %43 : vector<2x128xf32>
    %48 = arith.addf %42, %47 : vector<2x128xf32>
    %c11 = arith.constant 11 : index
    %49 = memref.load %arg2[%c11] : memref<17xf32, #tpu.memory_space<smem>>
    %50 = vector.broadcast %49 : f32 to vector<2x128xf32>
    %51 = arith.mulf %50, %44 : vector<2x128xf32>
    %52 = arith.addf %48, %51 : vector<2x128xf32>
    %c126_i32 = arith.constant 126 : i32
    %53 = tpu.dynamic_rotate %1 by %c126_i32 dim 1 : vector<2x128xf32>, i32 -> vector<2x128xf32>
    %c126_i32_8 = arith.constant 126 : i32
    %54 = tpu.dynamic_rotate %2 by %c126_i32_8 dim 1 : vector<2x128xf32>, i32 -> vector<2x128xf32>
    %c5 = arith.constant 5 : index
    %55 = memref.load %arg2[%c5] : memref<17xf32, #tpu.memory_space<smem>>
    %56 = vector.broadcast %55 : f32 to vector<2x128xf32>
    %57 = arith.mulf %56, %53 : vector<2x128xf32>
    %58 = arith.addf %52, %57 : vector<2x128xf32>
    %c12 = arith.constant 12 : index
    %59 = memref.load %arg2[%c12] : memref<17xf32, #tpu.memory_space<smem>>
    %60 = vector.broadcast %59 : f32 to vector<2x128xf32>
    %61 = arith.mulf %60, %54 : vector<2x128xf32>
    %62 = arith.addf %58, %61 : vector<2x128xf32>
    %c125_i32 = arith.constant 125 : i32
    %63 = tpu.dynamic_rotate %1 by %c125_i32 dim 1 : vector<2x128xf32>, i32 -> vector<2x128xf32>
    %c125_i32_9 = arith.constant 125 : i32
    %64 = tpu.dynamic_rotate %2 by %c125_i32_9 dim 1 : vector<2x128xf32>, i32 -> vector<2x128xf32>
    %c6 = arith.constant 6 : index
    %65 = memref.load %arg2[%c6] : memref<17xf32, #tpu.memory_space<smem>>
    %66 = vector.broadcast %65 : f32 to vector<2x128xf32>
    %67 = arith.mulf %66, %63 : vector<2x128xf32>
    %68 = arith.addf %62, %67 : vector<2x128xf32>
    %c13 = arith.constant 13 : index
    %69 = memref.load %arg2[%c13] : memref<17xf32, #tpu.memory_space<smem>>
    %70 = vector.broadcast %69 : f32 to vector<2x128xf32>
    %71 = arith.mulf %70, %64 : vector<2x128xf32>
    %72 = arith.addf %68, %71 : vector<2x128xf32>
    %cst_10 = arith.constant 0.000000e+00 : f32
    %73 = vector.broadcast %cst_10 : f32 to vector<2x128xf32>
    %74 = arith.maximumf %72, %73 : vector<2x128xf32>
    %c15 = arith.constant 15 : index
    %75 = memref.load %arg2[%c15] : memref<17xf32, #tpu.memory_space<smem>>
    %76 = vector.broadcast %75 : f32 to vector<2x128xf32>
    %77 = arith.mulf %74, %76 : vector<2x128xf32>
    %c16 = arith.constant 16 : index
    %78 = memref.load %arg2[%c16] : memref<17xf32, #tpu.memory_space<smem>>
    %79 = vector.broadcast %78 : f32 to vector<2x128xf32>
    %80 = arith.addf %77, %79 : vector<2x128xf32>
    %81 = arith.negf %80 : vector<2x128xf32>
    %82 = math.exp %81 : vector<2x128xf32>
    %cst_11 = arith.constant 1.000000e+00 : f32
    %83 = vector.broadcast %cst_11 : f32 to vector<2x128xf32>
    %84 = arith.addf %83, %82 : vector<2x128xf32>
    %85 = arith.divf %83, %84 : vector<2x128xf32>
    %c0_12 = arith.constant 0 : index
    %c0_13 = arith.constant 0 : index
    %c0_14 = arith.constant 0 : index
    %86 = vector.load %arg1[%c0_12, %c0_13, %c0_14] : memref<2x4x128xf32, #tpu.memory_space<vmem>>, vector<2x4x128xf32>
    %87 = vector.shape_cast %85 : vector<2x128xf32> to vector<2x1x128xf32>
    %88 = vector.broadcast %87 : vector<2x1x128xf32> to vector<2x4x128xf32>
    %89 = arith.mulf %86, %88 : vector<2x4x128xf32>
    %c0_15 = arith.constant 0 : index
    %c0_16 = arith.constant 0 : index
    %c0_17 = arith.constant 0 : index
    %90 = vector.load %arg3[%c0_15, %c0_16, %c0_17] : memref<2x4x128xf32, #tpu.memory_space<vmem>>, vector<2x4x128xf32>
    tpu.vector_store %arg3[%c0_15, %c0_16, %c0_17], %89 {strides = array<i32>} : memref<2x4x128xf32, #tpu.memory_space<vmem>>, vector<2x4x128xf32>,
    return
  }
  func.func @transform_0(%arg0: i32) -> (i32, i32, i32) {
    %c0_i32 = arith.constant 0 : i32
    %c0_i32_0 = arith.constant 0 : i32
    %c0_i32_1 = arith.constant 0 : i32
    return %arg0, %c0_i32, %c0_i32_0 : i32, i32, i32
  }
  func.func @transform_1(%arg0: i32) -> i32 {
    %c0_i32 = arith.constant 0 : i32
    %c0_i32_0 = arith.constant 0 : i32
    return %c0_i32 : i32
  }
  func.func @transform_2(%arg0: i32) -> (i32, i32, i32) {
    %c0_i32 = arith.constant 0 : i32
    %c0_i32_0 = arith.constant 0 : i32
    %c0_i32_1 = arith.constant 0 : i32
    return %arg0, %c0_i32, %c0_i32_0 : i32, i32, i32
  }
}

</mosaic_0001>

<bundles_post_ra>
// kernel: tpu_custom_call.1
= control target key start
LH: loop header
LB: loop body
LE: loop exit
PB: predicated region body
PF: predicated region fallthrough
CT: control target
= control target key end

     0   :  { %7 = vsyncpa [#allocation3], 0  ;;  %s382_s0 = inlined_call_operand.hbm [shape: f32[2,4,128], index: 0, kind: input, shape index: {}]   ;;  %s383_s1 = inlined_call_operand.hbm [shape: f32[17], index: 1, kind: input, shape index: {}]   ;;  %s384_s2 = inlined_call_operand.hbm [shape: f32[2,4,128], index: 2, kind: output, shape index: {}]  }
   0x1   :  { %8 = vsyncpa [#allocation5], 0 }
   0x2   :  { %9 = vsyncpa [#allocation4], 0  ;;  %s14_s11 = sshll.u32 %s382_s0, 4  ;;  %s327_s12 = smov [#allocation2]   ;;  %s15_s11 = int_to_ptr.hbm [resolvable:$true] %s14_s11 }
   0x3   :  { %s16_s13 = sshll.u32 %s327_s12, 4  ;;  %s28_s16 = sshll.u32 %s383_s1, 4  ;;  %s17_s13 = int_to_ptr.vmem [resolvable:$true] %s16_s13  ;;  %s29_s16 = int_to_ptr.hbm [resolvable:$true] %s28_s16 }
   0x4   :  { %s328_s17 = smov 64   ;;  %s329_s18 = smov 4  }
   0x5   :  { %22 = dma.hbm_to_vmem [thread:$0]  %s15_s11, 128, %s17_s13, [#allocation3], %s328_s17, %s328_s17, %s329_s18  }
   0x6   :  { %s330_s19 = smov [#allocation6]  }
   0x7   :  { %31 = dma.hbm_to_smem %s29_s16, 16, %s330_s19, [#allocation5]  }
   0x8   :  { %321 = dma.done.wait [#allocation3], 128  }
   0x9   :  { %322 = vsyncadd [#allocation3], 4294967168 }
   0xa   :  { %323 = dma.done.wait [#allocation5], 16  }
   0xb   :  { %324 = vsyncadd [#allocation5], 4294967280 }
   0xc   :  { %40 = sfence }
   0xd   :  { %v362_v0 = vld [vmem:[#allocation2] sm:$0xf]  ;;  %v364_v1 = vld [vmem:[#allocation2 + $0x4] sm:$0xf]  ;;  %vm43_vm0 = vcmask 1043456   ;;  %vm76_vm1 = vcmask 1041409  }
   0xe   :  { %v44_v2 = vsel %vm43_vm0, %v362_v0, 0.0  ;;  %v51_v3 = vsel %vm43_vm0, %v364_v1, 0.0  ;;  %v58_v4 = vsel %vm43_vm0, %v362_v0, -inf  ;;  %v65_v5 = vsel %vm43_vm0, %v364_v1, -inf  ;;  %s331_s0 = smov 3   ;;  %s332_s1 = smov 2  }
   0xf   :  { %v45_v6 = vrot.slane %v44_v2, 4  ;;  %v52_v7 = vrot.slane %v51_v3, 4  ;;  %v59_v8 = vrot.slane %v58_v4, 4  ;;  %v66_v9 = vrot.slane %v65_v5, 4  ;;  %s333_s20 = smov 1   ;;  %s334_s21 = smov 127  }
  0x10   :  { %s335_s22 = smov 126   ;;  %s336_s23 = smov 125  }
  0x11   :  { %v46_v10 = vadd.f32 %v45_v6, %v44_v2  ;;  %v53_v11 = vadd.f32 %v52_v7, %v51_v3  ;;  %v60_v12 = vmax.f32 %v58_v4, %v59_v8  ;;  %v67_v13 = vmax.f32 %v65_v5, %v66_v9  ;;  %s87_s24 = sld [smem:[#allocation6]]  ;;  %s337_s13 = smov [#allocation7]  }
  0x12   :  { %s229_s25 = sld [smem:[#allocation6 + $0xe]]  ;;  %s213_s14 = sshll.u32 %s337_s13, 4  ;;  %s214_s14 = int_to_ptr.vmem [resolvable:$true] %s213_s14 }
  0x13   :  { %v47_v14 = vrot.slane %v46_v10, 2  ;;  %v54_v15 = vrot.slane %v53_v11, 2  ;;  %v61_v16 = vrot.slane %v60_v12, 2  ;;  %v68_v17 = vrot.slane %v67_v13, 2  ;;  %s230_s26 = sld [smem:[#allocation6 + $0x7]]  ;;  %s215_s19 = sshll.u32 %s384_s2, 4  ;;  %s216_s19 = int_to_ptr.hbm [resolvable:$true] %s215_s19 }
  0x14   :  { %s231_s27 = sld [smem:[#allocation6 + $0x1]] }
  0x15   :  { %v48_v18 = vadd.f32 %v47_v14, %v46_v10  ;;  %v55_v19 = vadd.f32 %v54_v15, %v53_v11  ;;  %v62_v20 = vmax.f32 %v60_v12, %v61_v16  ;;  %v69_v21 = vmax.f32 %v67_v13, %v68_v17  ;;  %s232_s28 = sld [smem:[#allocation6 + $0x8]] }
  0x16   :  { %s233_s29 = sld [smem:[#allocation6 + $0x2]] }
  0x17   :  { %v49_v22 = vrot.slane %v48_v18, 1  ;;  %v56_v23 = vrot.slane %v55_v19, 1  ;;  %v63_v26 = vrot.slane %v62_v20, 1  ;;  %v70_v27 = vrot.slane %v69_v21, 1  ;;  %s235_s30 = sld [smem:[#allocation6 + $0x3]] }
  0x18   :  { %v88_v35 = vstv %s87_s24  ;;  %s234_s3 = sld [smem:[#allocation6 + $0x9]]  ;;  %v73_v37 = vstv %s229_s25 }
  0x19   :  { %v50_v24 = vadd.f32 %v49_v22, %v48_v18  ;;  %v57_v25 = vadd.f32 %v56_v23, %v55_v19  ;;  %v64_v29 = vmax.f32 %v62_v20, %v63_v26  ;;  %v71_v30 = vmax.f32 %v69_v21, %v70_v27  ;;  %s236_s4 = sld [smem:[#allocation6 + $0xa]] }
  0x1a   :  { %v92_v38 = vstv %s230_s26  ;;  %v100_v40 = vstv %s231_s27  ;;  %s237_s5 = sld [smem:[#allocation6 + $0x4]] }
  0x1b   :  { %v77_v28 = vsel %vm76_vm1, %v57_v25, %v50_v24  ;;  %v83_v31 = vsel %vm76_vm1, %v71_v30, %v64_v29  ;;  %v104_v42 = vstv %s232_s28  ;;  %s238_s6 = sld [smem:[#allocation6 + $0xb]] }
  0x1c   :  { %79 = vrot.lane.b32.xlu0 %v77_v28, %s331_s0  ;;  %95 = vrot.lane.b32.xlu1 %v77_v28, %s332_s1  ;;  %v112_v50 = vstv %s233_s29  ;;  %s239_s7 = sld [smem:[#allocation6 + $0x5]] }
  0x1d   :  { %107 = vrot.lane.b32.xlu2 %v77_v28, %s333_s20  ;;  %v120_v49 = vstv %s235_s30  ;;  %s240_s8 = sld [smem:[#allocation6 + $0xc]] }
  0x1e   :  { %v116_v51 = vstv %s234_s3  ;;  %v121_v54 = vmul.f32 %v120_v49, %v50_v24  ;;  %v122_v55 = vmul.f32 %v120_v49, %v57_v25  ;;  %s241_s9 = sld [smem:[#allocation6 + $0x6]] }
  0x1f   :  { %v129_v53 = vstv %s236_s4  ;;  %s242_s10 = sld [smem:[#allocation6 + $0xd]] }
  0x20   :  { %v130_v59 = vmul.f32 %v129_v53, %v64_v29  ;;  %v131_v60 = vmul.f32 %v129_v53, %v71_v30  ;;  %v125_v2 = vsel %vm76_vm1, %v122_v55, %v121_v54  ;;  %v142_v6 = vstv %s237_s5  ;;  %s243_s11 = sld [smem:[#allocation6 + $0xf]] }
  0x21   :  { %v146_v8 = vstv %s238_s6  ;;  %s244_s12 = sld [smem:[#allocation6 + $0x10]] }
  0x22   :  { %v134_v5 = vsel %vm76_vm1, %v131_v60, %v130_v59  ;;  %v154_v11 = vstv %s239_s7 }
  0x23   :  { %v158_v12 = vstv %s240_s8 }
  0x24   :  { %85 = vrot.lane.b32.xlu0 %v83_v31, %s331_s0  ;;  %97 = vrot.lane.b32.xlu1 %v83_v31, %s332_s1  ;;  %v166_v16 = vstv %s241_s9 }
  0x25   :  { %109 = vrot.lane.b32.xlu2 %v83_v31, %s333_s20  ;;  %v170_v21 = vstv %s242_s10 }
  0x26   :  { %v175_v29 = vstv %s243_s11 }
  0x2c   :  { %137 = vrot.lane.b32.xlu0 %v77_v28, %s334_s21  ;;  %139 = vrot.lane.b32.xlu1 %v83_v31, %s334_s21 }
  0x2d   :  { %149 = vrot.lane.b32.xlu2 %v77_v28, %s335_s22 }
  0x34   :  { %151 = vrot.lane.b32.xlu0 %v83_v31, %s335_s22  ;;  %161 = vrot.lane.b32.xlu1 %v77_v28, %s336_s23 }
  0x35   :  { %163 = vrot.lane.b32.xlu2 %v83_v31, %s336_s23  ;;  %v178_v31 = vstv %s244_s12 }
  0x77   :  { %v108_v32 = vpop.permute.xlu2 %107 }
  0x78   :  { %v113_v56 = vmul.f32 %v112_v50, %v108_v32 }
  0x7f   :  { %v110_v39 = vpop.permute.xlu2 %109 }
  0x80   :  { %v117_v58 = vmul.f32 %v116_v51, %v110_v39 }
  0x87   :  { %v150_v3 = vpop.permute.xlu2 %149 }
  0x88   :  { %v155_v19 = vmul.f32 %v154_v11, %v150_v3 }
  0x8e   :  { %v80_v33 = vpop.permute.xlu0 %79  ;;  %v96_v34 = vpop.permute.xlu1 %95 }
  0x8f   :  { %v89_v36 = vmul.f32 %v88_v35, %v80_v33  ;;  %v101_v46 = vmul.f32 %v100_v40, %v96_v34  ;;  %v164_v22 = vpop.permute.xlu2 %163 }
  0x90   :  { %v171_v26 = vmul.f32 %v170_v21, %v164_v22 }
  0x91   :  { %v90_v44 = vadd.f32 %v89_v36, %v73_v37 }
  0x96   :  { %v86_v41 = vpop.permute.xlu0 %85  ;;  %v98_v43 = vpop.permute.xlu1 %97 }
  0x97   :  { %v93_v45 = vmul.f32 %v92_v38, %v86_v41  ;;  %v105_v48 = vmul.f32 %v104_v42, %v98_v43 }
  0x99   :  { %v94_v47 = vadd.f32 %v93_v45, %v90_v44 }
  0x9b   :  { %v102_v52 = vadd.f32 %v101_v46, %v94_v47 }
  0x9d   :  { %v106_v57 = vadd.f32 %v105_v48, %v102_v52 }
  0x9e   :  { %v138_v61 = vpop.permute.xlu0 %137  ;;  %v140_v62 = vpop.permute.xlu1 %139 }
  0x9f   :  { %v114_v63 = vadd.f32 %v113_v56, %v106_v57  ;;  %v143_v10 = vmul.f32 %v142_v6, %v138_v61  ;;  %v147_v15 = vmul.f32 %v146_v8, %v140_v62 }
  0xa1   :  { %v118_v4 = vadd.f32 %v117_v58, %v114_v63 }
  0xa3   :  { %v127_v7 = vadd.f32 %v125_v2, %v118_v4 }
  0xa5   :  { %v136_v9 = vadd.f32 %v134_v5, %v127_v7 }
  0xa6   :  { %v152_v13 = vpop.permute.xlu0 %151  ;;  %v162_v17 = vpop.permute.xlu1 %161 }
  0xa7   :  { %v144_v14 = vadd.f32 %v143_v10, %v136_v9  ;;  %v159_v20 = vmul.f32 %v158_v12, %v152_v13  ;;  %v167_v24 = vmul.f32 %v166_v16, %v162_v17 }
  0xa9   :  { %v148_v18 = vadd.f32 %v147_v15, %v144_v14 }
  0xab   :  { %v156_v23 = vadd.f32 %v155_v19, %v148_v18 }
  0xad   :  { %v160_v25 = vadd.f32 %v159_v20, %v156_v23 }
  0xaf   :  { %v168_v27 = vadd.f32 %v167_v24, %v160_v25 }
  0xb1   :  { %v172_v28 = vadd.f32 %v171_v26, %v168_v27 }
  0xb3   :  { %v173_v30 = vmax.f32 %v172_v28, 0.0 }
  0xb5   :  { %v176_v32 = vmul.f32 %v175_v29, %v173_v30 }
  0xb7   :  { %v179_v33 = vadd.f32 %v178_v31, %v176_v32 }
  0xb9   :  { %v245_v34 = vmul.f32 -1.442695, %v179_v33 }
  0xbb   :  { %257 = vpow2.f32 %v245_v34 }
  0xc1   :  { %v258_v35 = vpop.eup %257 }
  0xc2   :  { %v183_v36 = vadd.f32 1.0, %v258_v35 }
  0xc4   :  { %259 = vrcp.f32 %v183_v36  ;;  %v195_v40 = vand.u32 2147483648, %v183_v36  ;;  %v193_v42 = vand.u32 2147483647, %v183_v36  ;;  %vm189_vm3 = vweird.f32 %v183_v36 }
  0xc6   :  { %v196_v44 = vor.u32 1.1754944e-38, %v195_v40  ;;  %vm194_vm5 = vcmp.eq.f32.partialorder %v193_v42, 8.507059e+37 }
  0xca   :  { %v260_v37 = vpop.eup %259 }
  0xcb   :  { %v185_v38 = vmul.f32 %v260_v37, %v183_v36  ;;  %vm190_vm2 = vweird.f32 %v260_v37 }
  0xcc   :  { %vm191_vm4 = vmor %vm189_vm3, %vm190_vm2 }
  0xcd   :  { %v186_v39 = vsub.f32 1.0, %v185_v38 }
  0xcf   :  { %v187_v41 = vmul.f32 %v260_v37, %v186_v39 }
  0xd1   :  { %v188_v43 = vadd.f32 %v260_v37, %v187_v41 }
  0xd3   :  { %v192_v45 = vsel %vm191_vm4, %v260_v37, %v188_v43 }
  0xd4   :  { %v197_v46 = vsel %vm194_vm5, %v196_v44, %v192_v45 }
  0xd5   :  { %v200_v47 = vrot.slane %v197_v46, 1  ;;  %v201_v48 = vperm.slane %v197_v46, 0 }
  0xd7   :  { %v202_v49 = vperm.slane %v200_v47, 0  ;;  %v205_v50 = vmul.f32 %v201_v48, %v362_v0 }
  0xd9   :  { %v206_v51 = vmul.f32 %v202_v49, %v364_v1  ;;  %207 = vst [vmem:[#allocation7] sm:$0xf] %v205_v50 }
  0xdb   :  { %208 = vst [vmem:[#allocation7 + $0x4] sm:$0xf] %v206_v51 }
  0xdc   :  { %221 = dma.vmem_to_hbm [thread:$0]  %s214_s14, 128, %s216_s19, [#allocation4], %s328_s17, %s328_s17, %s329_s18  }
  0xdd   :  { %325 = dma.done.wait [#allocation4], 128  }
  0xde   :  { %326 = vsyncadd [#allocation4], 4294967168 }
  0xdf   :  { %226 = vsyncpa [#allocation3], 1 }
  0xe0   :  { %227 = vsyncpa [#allocation4], 1 }
  0xe1   :  { %228 = vsyncpa [#allocation5], 1 }

</bundles_post_ra>
